<compile_context>
chip_gen: v6e
topology: v6e:2x2x1
jax: 0.10.0
libtpu: 0.0.40
codegen_flags: <defaults>
</compile_context>

<pallas_src>
import functools

import jax
import jax.numpy as jnp
from jax.experimental import pallas as pl
from jax.experimental.pallas import tpu as pltpu


def _round_up(x, m):
    return ((x + m - 1) // m) * m


def _pick_vmem_limit():
    """Per-generation scoped-VMEM limit (~3/4 of physical, capped at 100 MiB)."""
    cap = 128 * 1024 * 1024
    try:
        cap = int(getattr(pltpu.get_tpu_info(), "vmem_capacity_bytes", cap))
    except Exception:  # best-effort hardware query; fall back to v5e/v6e size
        pass
    return min(100 * 1024 * 1024, (cap * 3) // 4)


def _agg_kernel(a_ref, wh_ref, o_ref, *, tk, wh_resident):
    """o[i_tile] += A_norm_e[i_tile, k_tile] @ Wh_e[k_tile]  (f32 MXU accumulation)."""
    e = pl.program_id(1)
    k = pl.program_id(2)

    @pl.when(jnp.logical_and(e == 0, k == 0))
    def _():
        o_ref[...] = jnp.zeros_like(o_ref)

    if wh_resident:
        # wh_ref is the whole [E, Ns_p, Fp] stack, DMA'd into VMEM exactly once.
        off = pl.multiple_of(k * tk, tk)
        wh = wh_ref[e, pl.ds(off, tk), :]
    else:
        wh = wh_ref[...]
    o_ref[...] += jnp.dot(a_ref[...], wh, preferred_element_type=jnp.float32)


def hetero_rgcn_aggregate(a_stack, wh_stack, *, tm, tk, wh_resident, vmem_limit):
    """h = sum_e A_norm_e @ Wh_e  for one destination node type.

    a_stack:  [E, Nd_p, Ns_p] bf16 row-normalized (1/deg folded in), zero-padded
    wh_stack: [E, Ns_p, Fp]   bf16 per-etype Linear outputs, zero-padded
    """
    e_cnt, nd_p, ns_p = a_stack.shape
    fp = wh_stack.shape[-1]
    grid = (nd_p // tm, e_cnt, ns_p // tk)

    if wh_resident:
        # Constant block index -> whole Wh stack read from HBM once per forward.
        wh_spec = pl.BlockSpec((e_cnt, ns_p, fp), lambda i, e, k: (0, 0, 0))
    else:
        wh_spec = pl.BlockSpec((None, tk, fp), lambda i, e, k: (e, k, 0))

    kernel = functools.partial(_agg_kernel, tk=tk, wh_resident=wh_resident)
    return pl.pallas_call(
        kernel,
        out_shape=jax.ShapeDtypeStruct((nd_p, fp), jnp.float32),
        grid_spec=pltpu.PrefetchScalarGridSpec(
            num_scalar_prefetch=0,
            grid=grid,
            in_specs=[
                pl.BlockSpec((None, tm, tk), lambda i, e, k: (e, i, k)),
                wh_spec,
            ],
            # Output block index constant across (e, k) -> VMEM-resident accumulator.
            out_specs=pl.BlockSpec((tm, fp), lambda i, e, k: (i, 0)),
        ),
        compiler_params=pltpu.CompilerParams(
            dimension_semantics=("parallel", "arbitrary", "arbitrary"),
            vmem_limit_bytes=vmem_limit,
        ),
    )(a_stack, wh_stack)


def prepare_hetero_graph(canonical_etypes, adjs, node_counts, out_size,
                         *, max_tm=1024, max_tk=2048):
    """One-time static prep: group etypes by dsttype; row-normalize, pad,
    bf16-cast and stack the adjacencies; pick hardware-aligned tiles."""
    fp = _round_up(out_size, 128)   # lane-dense output columns / full MXU width
    by_dst = {}
    for (srctype, etype, dsttype) in canonical_etypes:
        by_dst.setdefault(dsttype, []).append((srctype, etype))

    prep = {}
    for dsttype, rels in by_dst.items():
        nd = node_counts[dsttype]
        for _, etype in rels:
            assert adjs[etype].shape[0] == nd, (dsttype, etype, adjs[etype].shape)
        ns_max = max(node_counts[src] for src, _ in rels)

        # Row tile: multiple of 16 (bf16 sublane packing), as large as possible
        # for HBM-BW efficiency, but keep >=2 row tiles when the graph allows it
        # so the "parallel" axis can shard across v7x's two TensorCores.
        tm = min(max_tm, _round_up(nd, 16))
        while tm > 16 and _round_up(nd, tm) // tm < 2:
            tm = max(16, _round_up(tm // 2, 16))
        nd_p = _round_up(nd, tm)

        # K tile: multiple of 256 (v6e/v7x MXU depth), big enough to amortize
        # the ~0.35us per-grid-step overhead against the A-tile DMA.
        tk = min(max_tk, _round_up(ns_max, 256))
        ns_p = _round_up(ns_max, tk)

        a_list, rel_meta = [], []
        for srctype, etype in rels:
            ns = node_counts[srctype]
            a = adjs[etype].astype(jnp.float32)
            assert a.shape == (nd, ns), (etype, a.shape, nd, ns)
            deg = a.sum(axis=1, keepdims=True)
            # Fold the fn.mean 1/deg scaling into A (deg==0 rows contribute 0).
            a = jnp.where(deg > 0, a / jnp.maximum(deg, 1.0), 0.0)
            a = jnp.pad(a, ((0, nd_p - nd), (0, ns_p - ns)))
            a_list.append(a.astype(jnp.bfloat16))
            rel_meta.append((srctype, etype, ns))

        prep[dsttype] = dict(
            a_stack=jnp.stack(a_list),       # [E, nd_p, ns_p] bf16, normalized
            rels=rel_meta, nd=nd, nd_p=nd_p, ns_p=ns_p,
            tm=tm, tk=tk, fp=fp,
        )
    return prep


def hetero_rgcn_layer(prep, feat_dict, weights, biases, *, vmem_limit=None):
    """HeteroRGCNLayer.forward given a prepared (static) graph.

    weights: dict etype -> [in_size, out_size] (nn.Linear weight, pre-transposed)
    biases:  dict etype -> [out_size]
    Returns: dict ntype -> [N_ntype, out_size] float32
    """
    if vmem_limit is None:
        vmem_limit = _pick_vmem_limit()
    fout = next(iter(weights.values())).shape[-1]

    out = {}
    for dsttype, p in prep.items():
        ns_p, fp = p["ns_p"], p["fp"]
        wh_list = []
        for srctype, etype, ns in p["rels"]:
            # Tiny-K per-etype Linear stays in plain XLA (would waste MXU depth).
            wh = feat_dict[srctype] @ weights[etype] + biases[etype]   # [ns, fout]
            wh = jnp.pad(wh, ((0, ns_p - ns), (0, fp - fout)))
            wh_list.append(wh.astype(jnp.bfloat16))
        wh_stack = jnp.stack(wh_list)                                  # [E, ns_p, fp]
        e_cnt = wh_stack.shape[0]

        # Keep Wh fully VMEM-resident (one HBM read per forward) when it fits the
        # per-generation budget; otherwise stream it per (etype, k-tile).
        resident_bytes = (2 * e_cnt * ns_p * fp * 2        # Wh stack (x2 buffering)
                          + 2 * p["tm"] * p["tk"] * 2      # A double buffer
                          + 2 * p["tm"] * fp * 4)          # output block
        wh_resident = resident_bytes < int(0.8 * vmem_limit)

        h = hetero_rgcn_aggregate(
            p["a_stack"], wh_stack, tm=p["tm"], tk=p["tk"],
            wh_resident=wh_resident, vmem_limit=vmem_limit)
        out[dsttype] = h[: p["nd"], :fout]
    return out


def _row_normalize(a):
    deg = a.sum(axis=1, keepdims=True)
    return jnp.where(deg > 0, a / jnp.maximum(deg, 1.0), 0.0)


def _reference(feat_dict, weights, biases, canonical_etypes, adjs):
    out = {}
    for (srctype, etype, dsttype) in canonical_etypes:
        a = _row_normalize(adjs[etype].astype(jnp.float32))
        wh = feat_dict[srctype] @ weights[etype] + biases[etype]
        out[dsttype] = out.get(dsttype, 0.0) + a @ wh
    return out


if __name__ == "__main__":
    key = jax.random.PRNGKey(0)

    # Small synthetic ACM-like heterograph: paper / author / subject node types.
    NP, NA, NL = 32, 16, 8
    IN_SIZE, OUT_SIZE = 16, 32

    k_pa, k_pp, k_pl, k_fp, k_fa, k_fl, k_w, k_b = jax.random.split(key, 8)

    PvsA = (jax.random.uniform(k_pa, (NP, NA)) < 0.2).astype(jnp.float32)
    PvsP = (jax.random.uniform(k_pp, (NP, NP)) < 0.1).astype(jnp.float32)
    PvsL = (jax.random.uniform(k_pl, (NP, NL)) < 0.3).astype(jnp.float32)

    canonical_etypes = [
        ("paper",   "written-by", "author"),
        ("author",  "writing",    "paper"),
        ("paper",   "citing",     "paper"),
        ("paper",   "cited",      "paper"),
        ("paper",   "is-about",   "subject"),
        ("subject", "has",        "paper"),
    ]
    # adjacency[etype][dst, src] = 1 iff edge src->dst of this etype exists.
    adjs = {
        "written-by": PvsA.T,   # paper -> author
        "writing":    PvsA,     # author -> paper
        "citing":     PvsP.T,   # paper -> paper
        "cited":      PvsP,     # paper -> paper (transpose edges)
        "is-about":   PvsL.T,   # paper -> subject
        "has":        PvsL,     # subject -> paper
    }
    node_counts = {"paper": NP, "author": NA, "subject": NL}

    feat_dict = {
        "paper":   jax.random.normal(k_fp, (NP, IN_SIZE), jnp.float32),
        "author":  jax.random.normal(k_fa, (NA, IN_SIZE), jnp.float32),
        "subject": jax.random.normal(k_fl, (NL, IN_SIZE), jnp.float32),
    }

    # Deterministic per-etype Linear(in_size, out_size) params (weights pre-transposed).
    etype_names = [e for (_, e, _) in canonical_etypes]
    w_keys = jax.random.split(k_w, len(etype_names))
    b_keys = jax.random.split(k_b, len(etype_names))
    scale = 1.0 / jnp.sqrt(jnp.float32(IN_SIZE))
    weights = {
        e: jax.random.uniform(wk, (IN_SIZE, OUT_SIZE), jnp.float32, -scale, scale)
        for e, wk in zip(etype_names, w_keys)
    }
    biases = {
        e: jax.random.uniform(bk, (OUT_SIZE,), jnp.float32, -scale, scale)
        for e, bk in zip(etype_names, b_keys)
    }

    # One-time static graph prep (normalized / padded / bf16 / stacked adjacency).
    prep = prepare_hetero_graph(canonical_etypes, adjs, node_counts, OUT_SIZE)

    out = hetero_rgcn_layer(prep, feat_dict, weights, biases)
    out = {k: jax.block_until_ready(v) for k, v in out.items()}

    ref = _reference(feat_dict, weights, biases, canonical_etypes, adjs)
    for ntype in out:
        assert out[ntype].shape == ref[ntype].shape, ntype
        # bf16 A/Wh streams (f32 MXU accumulation) -> loosened tolerance vs f32 ref.
        assert jnp.allclose(out[ntype], ref[ntype], atol=3e-2, rtol=3e-2), ntype

    print("KERNEL_OK")
</pallas_src>

<mosaic_0001>
module attributes {stable_mosaic.version = 11 : i64} {
  func.func @_agg_kernel(%arg0: i32, %arg1: i32, %arg2: i32, %arg3: memref<1x16x256xbf16, #tpu.memory_space<vmem>>, %arg4: memref<1x256x128xbf16, #tpu.memory_space<vmem>>, %arg5: memref<16x128xf32, #tpu.memory_space<vmem>>) attributes {dimension_semantics = [#tpu.dimension_semantics<parallel>, #tpu.dimension_semantics<arbitrary>, #tpu.dimension_semantics<arbitrary>], iteration_bounds = array<i64: 1, 1, 1>, scalar_prefetch = 0 : i64, scratch_operands = 0 : i64, tpu.core_type = #tpu.core_type<tc>, window_params = [{transform_indices = @transform_0, window_bounds = array<i64: 1, 16, 256>}, {pipeline_mode = #tpu.pipeline_mode<synchronous>, transform_indices = @transform_1, window_bounds = array<i64: 1, 256, 128>}, {transform_indices = @transform_2, window_bounds = array<i64: 16, 128>}]} {
    %c0_i32 = arith.constant 0 : i32
    %0 = arith.cmpi eq, %arg1, %c0_i32 : i32
    %c0_i32_0 = arith.constant 0 : i32
    %1 = arith.cmpi eq, %arg2, %c0_i32_0 : i32
    %2 = arith.andi %0, %1 : i1
    %3 = arith.extui %2 : i1 to i32
    %c0_i32_1 = arith.constant 0 : i32
    %4 = arith.cmpi ne, %3, %c0_i32_1 : i32
    scf.if %4 {
      %cst_9 = arith.constant 0.000000e+00 : f32
      %17 = vector.broadcast %cst_9 : f32 to vector<16x128xf32>
      %c0_10 = arith.constant 0 : index
      %c0_11 = arith.constant 0 : index
      %18 = vector.load %arg5[%c0_10, %c0_11] : memref<16x128xf32, #tpu.memory_space<vmem>>, vector<16x128xf32>
      tpu.vector_store %arg5[%c0_10, %c0_11], %17 {strides = array<i32>} : memref<16x128xf32, #tpu.memory_space<vmem>>, vector<16x128xf32>,
    } else {
    }
    %c256_i32 = arith.constant 256 : i32
    %5 = arith.muli %arg2, %c256_i32 : i32
    %6 = tpu.assume_multiple %5, 256 : i32
    %7 = arith.index_cast %arg1 : i32 to index
    %8 = arith.index_cast %6 : i32 to index
    %c0 = arith.constant 0 : index
    %9 = vector.load %arg4[%7, %8, %c0] : memref<1x256x128xbf16, #tpu.memory_space<vmem>>, vector<1x256x128xbf16>
    %10 = vector.shape_cast %9 : vector<1x256x128xbf16> to vector<256x128xbf16>
    %c0_2 = arith.constant 0 : index
    %c0_3 = arith.constant 0 : index
    %11 = vector.load %arg5[%c0_2, %c0_3] : memref<16x128xf32, #tpu.memory_space<vmem>>, vector<16x128xf32>
    %c0_4 = arith.constant 0 : index
    %c0_5 = arith.constant 0 : index
    %c0_6 = arith.constant 0 : index
    %12 = vector.load %arg3[%c0_4, %c0_5, %c0_6] : memref<1x16x256xbf16, #tpu.memory_space<vmem>>, vector<1x16x256xbf16>
    %13 = vector.shape_cast %12 : vector<1x16x256xbf16> to vector<16x256xbf16>
    %cst = arith.constant dense<0.000000e+00> : vector<16x128xf32>
    %14 = tpu.matmul %13, %10, %cst {dimension_numbers = #tpu.dot_dimension_numbers<[1], [0], [0], [1], [0, 0, 1, 1], [], []>} : vector<16x256xbf16>, vector<256x128xbf16>, vector<16x128xf32> -> vector<16x128xf32>
    %15 = arith.addf %11, %14 : vector<16x128xf32>
    %c0_7 = arith.constant 0 : index
    %c0_8 = arith.constant 0 : index
    %16 = vector.load %arg5[%c0_7, %c0_8] : memref<16x128xf32, #tpu.memory_space<vmem>>, vector<16x128xf32>
    tpu.vector_store %arg5[%c0_7, %c0_8], %15 {strides = array<i32>} : memref<16x128xf32, #tpu.memory_space<vmem>>, vector<16x128xf32>,
    return
  }
  func.func @transform_0(%arg0: i32, %arg1: i32, %arg2: i32) -> (i32, i32, i32) {
    %c0_i32 = arith.constant 0 : i32
    return %arg1, %arg0, %arg2 : i32, i32, i32
  }
  func.func @transform_1(%arg0: i32, %arg1: i32, %arg2: i32) -> (i32, i32, i32) {
    %c0_i32 = arith.constant 0 : i32
    %c0_i32_0 = arith.constant 0 : i32
    %c0_i32_1 = arith.constant 0 : i32
    %c0_i32_2 = arith.constant 0 : i32
    return %c0_i32, %c0_i32_0, %c0_i32_1 : i32, i32, i32
  }
  func.func @transform_2(%arg0: i32, %arg1: i32, %arg2: i32) -> (i32, i32) {
    %c0_i32 = arith.constant 0 : i32
    %c0_i32_0 = arith.constant 0 : i32
    return %arg0, %c0_i32 : i32, i32
  }
}

</mosaic_0001>

<bundles_post_ra>
// kernel: tpu_custom_call.1
= control target key start
LH: loop header
LB: loop body
LE: loop exit
PB: predicated region body
PF: predicated region fallthrough
CT: control target
= control target key end

     0   :  { %7 = vsyncpa [#allocation3], 0  ;;  %s433_s0 = inlined_call_operand.hbm [shape: bf16[1,16,256], index: 0, kind: input, shape index: {}]   ;;  %s434_s1 = inlined_call_operand.hbm [shape: bf16[1,256,128], index: 1, kind: input, shape index: {}]   ;;  %s435_s2 = inlined_call_operand.hbm [shape: f32[16,128], index: 2, kind: output, shape index: {}]  }
   0x1   :  { %8 = vsyncpa [#allocation6], 0 }
   0x2   :  { %9 = vsyncpa [#allocation4], 0  ;;  %s396_s9 = smov [#allocation2]  }
   0x3   :  { %s15_s10 = sshll.u32 %s396_s9, 4  ;;  %s16_s10 = int_to_ptr.vmem [resolvable:$true] %s15_s10 }
   0x4   :  { %s338_s11 = scalar_lea.vmem %s16_s10, 256  ;;  %p343_p1 = scmp.lt.s32.totalorder %s16_s10, %s16_s10 }
   0x5   :  { %p339_p0 = scmp.ne.s32.totalorder %s16_s10, %s338_s11  ;;  %p344_p2 = scmp.lt.s32.totalorder %s338_s11, %s338_s11 }
   0x7   :  { %p345_p3 = por %p344_p2, %p343_p1 }
   0x9   :  { %p346_p4 = pnand %p345_p3, %p339_p0 }
   0xb   :  { %349 = shalt.err (!%p346_p4)
}
   0xc   :  { %s397_s12 = smov 128   ;;  %s398_s13 = smov 8  }
   0xd   :  { %21 = dma.hbm_to_vmem [thread:$0]  %s433_s0, 256, %s16_s10, [#allocation3], %s397_s12, %s397_s12, %s398_s13  }
   0xe   :  { %s399_s16 = smov [#allocation5]  }
   0xf   :  { %s27_s17 = sshll.u32 %s399_s16, 4  ;;  %s28_s17 = int_to_ptr.vmem [resolvable:$true] %s27_s17 }
  0x10   :  { %s358_s18 = scalar_lea.vmem %s28_s17, 2048  ;;  %p363_p6 = scmp.lt.s32.totalorder %s28_s17, %s28_s17 }
  0x11   :  { %p359_p5 = scmp.ne.s32.totalorder %s28_s17, %s358_s18  ;;  %p364_p7 = scmp.lt.s32.totalorder %s358_s18, %s358_s18 }
  0x13   :  { %p365_p8 = por %p364_p7, %p363_p6 }
  0x15   :  { %p366_p9 = pnand %p365_p8, %p359_p5 }
  0x17   :  { %369 = shalt.err (!%p366_p9)
}
  0x18   :  { %s400_s19 = smov 64   ;;  %s401_s20 = smov 4  }
  0x19   :  { %33 = dma.hbm_to_vmem [thread:$0]  %s434_s1, 2048, %s28_s17, [#allocation6], %s400_s19, %s400_s19, %s401_s20  }
  0x1a   :  { %390 = dma.done.wait [#allocation3], 256  }
  0x1b   :  { %391 = vsyncadd [#allocation3], 4294967040 }
  0x1c   :  { %392 = dma.done.wait [#allocation6], 2048  }
  0x1d   :  { %393 = vsyncadd [#allocation6], 4294965248  ;;  %v311_v0 = vld [vmem:[#allocation5 + $0x78] sm:$0xff]   ;;  %v313_v2 = vld [vmem:[#allocation5 + $0x70] sm:$0xff]   ;;  %s402_s0 = smov [#allocation7]  }
  0x1e   :  { %v312_v1 = vld [vmem:[#allocation5 + $0x38] sm:$0xff]   ;;  %281 = vmatprep.subr.bf16.mxu0 %v311_v0  ;;  %v314_v3 = vld [vmem:[#allocation5 + $0x30] sm:$0xff]   ;;  %v315_v4 = vld [vmem:[#allocation5 + $0x68] sm:$0xff]   ;;  %s248_s1 = sshll.u32 %s402_s0, 4  ;;  %s249_s1 = int_to_ptr.vmem [resolvable:$true] %s248_s1 }
  0x1f   :  { %282 = vmatpush3.bf16.msra.mxu0 %v312_v1  ;;  %v316_v5 = vld [vmem:[#allocation5 + $0x28] sm:$0xff]   ;;  %v317_v6 = vld [vmem:[#allocation5 + $0x60] sm:$0xff]   ;;  %v319_v8 = vld [vmem:[#allocation5 + $0x58] sm:$0xff]   ;;  %s370_s23 = scalar_lea.vmem %s249_s1, 256  ;;  %p375_p11 = scmp.lt.s32.totalorder %s249_s1, %s249_s1 }
  0x20   :  { %283 = vmatprep.subr.bf16.mxu0 %v313_v2  ;;  %v318_v7 = vld [vmem:[#allocation5 + $0x20] sm:$0xff]   ;;  %v320_v9 = vld [vmem:[#allocation5 + $0x18] sm:$0xff]   ;;  %v321_v10 = vld [vmem:[#allocation5 + $0x50] sm:$0xff]   ;;  %p371_p10 = scmp.ne.s32.totalorder %s249_s1, %s370_s23  ;;  %p376_p12 = scmp.lt.s32.totalorder %s370_s23, %s370_s23 }
  0x21   :  { %v329_v11 = vld [vmem:[#allocation2 + $0x4] ss:$8 sps:$4 sm:$0xff]   ;;  %v323_v13 = vld [vmem:[#allocation5 + $0x48] sm:$0xff]   ;;  %v325_v15 = vld [vmem:[#allocation5 + $0x40] sm:$0xff]  }
  0x22   :  { %v322_v12 = vld [vmem:[#allocation5 + $0x10] sm:$0xff]   ;;  %230 = vmatprep.mubr.bf16.mxu0 %v329_v11  ;;  %v324_v14 = vld [vmem:[#allocation5 + $0x8] sm:$0xff]   ;;  %v326_v16 = vld [vmem:[#allocation5] sm:$0xff]   ;;  %p377_p13 = por %p376_p12, %p375_p11 }
  0x23   :  { %284 = vmatpush3.bf16.msra.mxu0 %v314_v3  ;;  %v327_v17 = vld [vmem:[#allocation2] ss:$8 sps:$4 sm:$0xff]  }
  0x24   :  { %285 = vmatprep.subr.bf16.mxu0 %v315_v4  ;;  %p378_p0 = pnand %p377_p13, %p371_p10 }
  0x27   :  { %286 = vmatpush3.bf16.msra.mxu0 %v316_v5 }
  0x28   :  { %287 = vmatprep.subr.bf16.mxu0 %v317_v6 }
  0x2b   :  { %288 = vmatpush3.bf16.msra.mxu0 %v318_v7 }
  0x2c   :  { %289 = vmatprep.subr.bf16.mxu0 %v319_v8 }
  0x2f   :  { %290 = vmatpush3.bf16.msra.mxu0 %v320_v9 }
  0x30   :  { %291 = vmatprep.subr.bf16.mxu0 %v321_v10 }
  0x33   :  { %292 = vmatpush3.bf16.msra.mxu0 %v322_v12 }
  0x34   :  { %293 = vmatprep.subr.bf16.mxu0 %v323_v13 }
  0x37   :  { %294 = vmatpush3.bf16.msra.mxu0 %v324_v14 }
  0x38   :  { %295 = vmatprep.subr.bf16.mxu0 %v325_v15 }
  0x3b   :  { %296 = vmatpush3.bf16.msra.mxu0 %v326_v16 }
  0x3e   :  { %231 = vmatmul.mubr.bf16.vlgmr.msra.gmra.mxu0 %v327_v17 }
  0xfe   :  { %v297_v18 = vpop.f32.mrf.mxu0 }
 0x100   :  { %v298_v19 = vpop.f32.mrf.mxu0 }
 0x101   :  { %v299_v20 = vadd.f32 %v298_v19, %v297_v18 }
 0x102   :  { %v300_v21 = vpop.f32.mrf.mxu0 }
 0x103   :  { %241 = vst [vmem:[#allocation7] sm:$0xff] %v299_v20 }
 0x104   :  { %v301_v22 = vpop.f32.mrf.mxu0 }
 0x105   :  { %v302_v23 = vadd.f32 %v301_v22, %v300_v21 }
 0x107   :  { %242 = vst [vmem:[#allocation7 + $0x8] sm:$0xff] %v302_v23 }
 0x108   :  { %381 = shalt.err (!%p378_p0)
}
 0x109   :  { %254 = dma.vmem_to_hbm [thread:$0]  %s249_s1, 256, %s435_s2, [#allocation4], %s397_s12, %s397_s12, %s398_s13  }
 0x10a   :  { %394 = dma.done.wait [#allocation4], 256  }
 0x10b   :  { %395 = vsyncadd [#allocation4], 4294967040 }
 0x10c   :  { %258 = vsyncpa [#allocation3], 1 }
 0x10d   :  { %259 = vsyncpa [#allocation6], 1 }
 0x10e   :  { %260 = vsyncpa [#allocation4], 1 }

</bundles_post_ra>
